<compile_context>
chip_gen: v7x
topology: tpu7x:2x2x1
jax: 0.10.0
libtpu: 0.0.40
codegen_flags: <defaults>
</compile_context>

<pallas_src>
import functools

import jax
import jax.numpy as jnp
from jax.experimental import pallas as pl
from jax.experimental.pallas import tpu as pltpu

LANE = 128                  # vreg lane width; hidden layers padded to this
DEFAULT_BLOCK_BATCH = 2048  # rows per grid step (big tiles amortize ~0.35us/step overhead)


def _round_up(x, m):
    return ((x + m - 1) // m) * m


def attack_mlp_kernel(x_ref, w1_ref, b1_ref, w2_ref, b2_ref, w3_ref, b3_ref, out_ref):
    x = x_ref[...]                                                        # [TB, D] bf16
    # Layer 1: Linear(D, 128-padded) + ReLU, f32 accumulation on the MXU.
    h1 = jnp.dot(x, w1_ref[...], preferred_element_type=jnp.float32) + b1_ref[...]
    h1 = jnp.maximum(h1, 0.0).astype(jnp.bfloat16)                        # [TB, 128]
    # Layer 2: Linear(128-padded, 128-padded) + ReLU.
    h2 = jnp.dot(h1, w2_ref[...], preferred_element_type=jnp.float32) + b2_ref[...]
    h2 = jnp.maximum(h2, 0.0).astype(jnp.bfloat16)                        # [TB, 128]
    # Layer 3: Linear(128-padded, 2) -> logits (no activation).
    logits = jnp.dot(h2, w3_ref[...], preferred_element_type=jnp.float32) + b3_ref[...]
    out_ref[...] = logits.astype(out_ref.dtype)                           # [TB, 2]


def prepare_params(params):
    """Pad hidden widths (64, 32) to 128 lanes and cast weights to bf16, once, off the hot path."""
    w1, b1, w2, b2, w3, b3 = params               # logical (PyTorch) shapes, f32, W as [in, out]
    in_dim, h1_dim = w1.shape
    h2_dim, out_dim = w2.shape[1], w3.shape[1]
    h1p = max(_round_up(h1_dim, LANE), LANE)      # 128
    h2p = max(_round_up(h2_dim, LANE), LANE)      # 128

    w1p = jnp.zeros((in_dim, h1p), jnp.bfloat16).at[:, :h1_dim].set(w1.astype(jnp.bfloat16))
    b1p = jnp.zeros((1, h1p), jnp.float32).at[:, :h1_dim].set(b1.reshape(1, h1_dim))
    w2p = jnp.zeros((h1p, h2p), jnp.bfloat16).at[:h1_dim, :h2_dim].set(w2.astype(jnp.bfloat16))
    b2p = jnp.zeros((1, h2p), jnp.float32).at[:, :h2_dim].set(b2.reshape(1, h2_dim))
    w3p = jnp.zeros((h2p, out_dim), jnp.bfloat16).at[:h2_dim, :].set(w3.astype(jnp.bfloat16))
    b3p = b3.reshape(1, out_dim).astype(jnp.float32)
    return (w1p, b1p, w2p, b2p, w3p, b3p)


@functools.partial(jax.jit, static_argnames=("block_batch",))
def attack_model_forward(x, padded_params, *, block_batch=DEFAULT_BLOCK_BATCH):
    w1p, b1p, w2p, b2p, w3p, b3p = padded_params
    batch, in_dim = x.shape
    h1p, h2p, out_dim = w1p.shape[1], w2p.shape[1], w3p.shape[1]

    xb = x.astype(jnp.bfloat16)

    # Batch tiling: multiple-of-8 sublane tiles, pad batch to a tile multiple.
    tb = min(block_batch, _round_up(batch, 8))
    padded_batch = _round_up(batch, tb)
    if padded_batch != batch:
        xb = jnp.pad(xb, ((0, padded_batch - batch), (0, 0)))
    grid = (padded_batch // tb,)

    flops = 2 * padded_batch * (in_dim * h1p + h1p * h2p + h2p * out_dim)
    weight_bytes = 2 * (w1p.size + w2p.size + w3p.size) + 4 * (b1p.size + b2p.size + b3p.size)
    bytes_accessed = padded_batch * in_dim * 2 + padded_batch * out_dim * 4 + weight_bytes

    out = pl.pallas_call(
        attack_mlp_kernel,
        out_shape=jax.ShapeDtypeStruct((padded_batch, out_dim), jnp.float32),
        grid=grid,
        in_specs=[
            pl.BlockSpec((tb, in_dim), lambda i: (i, 0)),        # x: streamed per batch tile
            pl.BlockSpec((in_dim, h1p), lambda i: (0, 0)),       # weights/biases: VMEM-resident
            pl.BlockSpec((1, h1p), lambda i: (0, 0)),
            pl.BlockSpec((h1p, h2p), lambda i: (0, 0)),
            pl.BlockSpec((1, h2p), lambda i: (0, 0)),
            pl.BlockSpec((h2p, out_dim), lambda i: (0, 0)),
            pl.BlockSpec((1, out_dim), lambda i: (0, 0)),
        ],
        out_specs=pl.BlockSpec((tb, out_dim), lambda i: (i, 0)),
        compiler_params=pltpu.CompilerParams(
            dimension_semantics=("parallel",),
            vmem_limit_bytes=32 * 1024 * 1024,
        ),
        cost_estimate=pl.CostEstimate(
            flops=flops, transcendentals=0, bytes_accessed=bytes_accessed
        ),
    )(xb, w1p, b1p, w2p, b2p, w3p, b3p)

    return out[:batch]


def init_params(key, input_dim):
    """Deterministic init mimicking PyTorch Linear default (uniform +/- 1/sqrt(fan_in))."""
    dims = [(input_dim, 64), (64, 32), (32, 2)]
    params = []
    for fan_in, fan_out in dims:
        kw, kb, key = jax.random.split(key, 3)
        bound = 1.0 / jnp.sqrt(float(fan_in))
        # stored as [in, out] so the kernel computes x @ W (== PyTorch x @ W.T with W [out,in])
        w = jax.random.uniform(kw, (fan_in, fan_out), jnp.float32, -bound, bound)
        b = jax.random.uniform(kb, (1, fan_out), jnp.float32, -bound, bound)
        params.extend([w, b])
    return tuple(params)


def reference_forward(x, params):
    """Pure-JAX f32 reference with PyTorch semantics."""
    w1, b1, w2, b2, w3, b3 = params
    h1 = jnp.maximum(x @ w1 + b1, 0.0)
    h2 = jnp.maximum(h1 @ w2 + b2, 0.0)
    return h2 @ w3 + b3


if __name__ == "__main__":
    key = jax.random.PRNGKey(0)
    input_dim = 32
    kx, kx2, kp = jax.random.split(key, 3)
    params = init_params(kp, input_dim)
    padded_params = prepare_params(params)

    # Small case (single tile).
    x = jax.random.normal(kx, (8, input_dim), dtype=jnp.float32)
    out = jax.block_until_ready(attack_model_forward(x, padded_params))
    ref = reference_forward(x, params)
    assert out.shape == (8, 2), out.shape
    assert jnp.allclose(out, ref, atol=5e-2, rtol=5e-2), "small-batch mismatch vs reference"

    # Multi-tile case exercising the batch grid + tail padding (300 rows, 128-row tiles -> 3 steps).
    x2 = jax.random.normal(kx2, (300, input_dim), dtype=jnp.float32)
    out2 = jax.block_until_ready(attack_model_forward(x2, padded_params, block_batch=128))
    ref2 = reference_forward(x2, params)
    assert out2.shape == (300, 2), out2.shape
    assert jnp.allclose(out2, ref2, atol=5e-2, rtol=5e-2), "tiled-batch mismatch vs reference"

    print("KERNEL_OK")
</pallas_src>

<mosaic_0001>
module attributes {stable_mosaic.version = 11 : i64} {
  func.func @attack_mlp_kernel(%arg0: i32, %arg1: memref<8x32xbf16, #tpu.memory_space<vmem>>, %arg2: memref<32x128xbf16, #tpu.memory_space<vmem>>, %arg3: memref<1x128xf32, #tpu.memory_space<vmem>>, %arg4: memref<128x128xbf16, #tpu.memory_space<vmem>>, %arg5: memref<1x128xf32, #tpu.memory_space<vmem>>, %arg6: memref<128x2xbf16, #tpu.memory_space<vmem>>, %arg7: memref<1x2xf32, #tpu.memory_space<vmem>>, %arg8: memref<8x2xf32, #tpu.memory_space<vmem>>) attributes {dimension_semantics = [#tpu.dimension_semantics<parallel>], iteration_bounds = array<i64: 1>, scalar_prefetch = 0 : i64, scratch_operands = 0 : i64, tpu.core_type = #tpu.core_type<tc>, window_params = [{transform_indices = @transform_0, window_bounds = array<i64: 8, 32>}, {pipeline_mode = #tpu.pipeline_mode<synchronous>, transform_indices = @transform_1, window_bounds = array<i64: 32, 128>}, {pipeline_mode = #tpu.pipeline_mode<synchronous>, transform_indices = @transform_2, window_bounds = array<i64: 1, 128>}, {pipeline_mode = #tpu.pipeline_mode<synchronous>, transform_indices = @transform_3, window_bounds = array<i64: 128, 128>}, {pipeline_mode = #tpu.pipeline_mode<synchronous>, transform_indices = @transform_4, window_bounds = array<i64: 1, 128>}, {pipeline_mode = #tpu.pipeline_mode<synchronous>, transform_indices = @transform_5, window_bounds = array<i64: 128, 2>}, {pipeline_mode = #tpu.pipeline_mode<synchronous>, transform_indices = @transform_6, window_bounds = array<i64: 1, 2>}, {transform_indices = @transform_7, window_bounds = array<i64: 8, 2>}]} {
    %c0 = arith.constant 0 : index
    %c0_0 = arith.constant 0 : index
    %0 = vector.load %arg1[%c0, %c0_0] : memref<8x32xbf16, #tpu.memory_space<vmem>>, vector<8x32xbf16>
    %c0_1 = arith.constant 0 : index
    %c0_2 = arith.constant 0 : index
    %1 = vector.load %arg2[%c0_1, %c0_2] : memref<32x128xbf16, #tpu.memory_space<vmem>>, vector<32x128xbf16>
    %cst = arith.constant dense<0.000000e+00> : vector<8x128xf32>
    %2 = tpu.matmul %0, %1, %cst {dimension_numbers = #tpu.dot_dimension_numbers<[1], [0], [0], [1], [0, 0, 1, 1], [], []>} : vector<8x32xbf16>, vector<32x128xbf16>, vector<8x128xf32> -> vector<8x128xf32>
    %c0_3 = arith.constant 0 : index
    %c0_4 = arith.constant 0 : index
    %3 = vector.load %arg3[%c0_3, %c0_4] : memref<1x128xf32, #tpu.memory_space<vmem>>, vector<1x128xf32>
    %4 = vector.broadcast %3 : vector<1x128xf32> to vector<8x128xf32>
    %5 = arith.addf %2, %4 : vector<8x128xf32>
    %cst_5 = arith.constant 0.000000e+00 : f32
    %6 = vector.broadcast %cst_5 : f32 to vector<8x128xf32>
    %7 = arith.maximumf %5, %6 : vector<8x128xf32>
    %8 = arith.truncf %7 : vector<8x128xf32> to vector<8x128xbf16>
    %c0_6 = arith.constant 0 : index
    %c0_7 = arith.constant 0 : index
    %9 = vector.load %arg4[%c0_6, %c0_7] : memref<128x128xbf16, #tpu.memory_space<vmem>>, vector<128x128xbf16>
    %cst_8 = arith.constant dense<0.000000e+00> : vector<8x128xf32>
    %10 = tpu.matmul %8, %9, %cst_8 {dimension_numbers = #tpu.dot_dimension_numbers<[1], [0], [0], [1], [0, 0, 1, 1], [], []>} : vector<8x128xbf16>, vector<128x128xbf16>, vector<8x128xf32> -> vector<8x128xf32>
    %c0_9 = arith.constant 0 : index
    %c0_10 = arith.constant 0 : index
    %11 = vector.load %arg5[%c0_9, %c0_10] : memref<1x128xf32, #tpu.memory_space<vmem>>, vector<1x128xf32>
    %12 = vector.broadcast %11 : vector<1x128xf32> to vector<8x128xf32>
    %13 = arith.addf %10, %12 : vector<8x128xf32>
    %cst_11 = arith.constant 0.000000e+00 : f32
    %14 = vector.broadcast %cst_11 : f32 to vector<8x128xf32>
    %15 = arith.maximumf %13, %14 : vector<8x128xf32>
    %16 = arith.truncf %15 : vector<8x128xf32> to vector<8x128xbf16>
    %c0_12 = arith.constant 0 : index
    %c0_13 = arith.constant 0 : index
    %17 = vector.load %arg6[%c0_12, %c0_13] : memref<128x2xbf16, #tpu.memory_space<vmem>>, vector<128x2xbf16>
    %cst_14 = arith.constant dense<0.000000e+00> : vector<8x2xf32>
    %18 = tpu.matmul %16, %17, %cst_14 {dimension_numbers = #tpu.dot_dimension_numbers<[1], [0], [0], [1], [0, 0, 1, 1], [], []>} : vector<8x128xbf16>, vector<128x2xbf16>, vector<8x2xf32> -> vector<8x2xf32>
    %c0_15 = arith.constant 0 : index
    %c0_16 = arith.constant 0 : index
    %19 = vector.load %arg7[%c0_15, %c0_16] : memref<1x2xf32, #tpu.memory_space<vmem>>, vector<1x2xf32>
    %20 = vector.broadcast %19 : vector<1x2xf32> to vector<8x2xf32>
    %21 = arith.addf %18, %20 : vector<8x2xf32>
    %c0_17 = arith.constant 0 : index
    %c0_18 = arith.constant 0 : index
    %22 = vector.load %arg8[%c0_17, %c0_18] : memref<8x2xf32, #tpu.memory_space<vmem>>, vector<8x2xf32>
    tpu.vector_store %arg8[%c0_17, %c0_18], %21 {strides = array<i32>} : memref<8x2xf32, #tpu.memory_space<vmem>>, vector<8x2xf32>,
    return
  }
  func.func @transform_0(%arg0: i32) -> (i32, i32) {
    %c0_i32 = arith.constant 0 : i32
    %c0_i32_0 = arith.constant 0 : i32
    return %arg0, %c0_i32 : i32, i32
  }
  func.func @transform_1(%arg0: i32) -> (i32, i32) {
    %c0_i32 = arith.constant 0 : i32
    %c0_i32_0 = arith.constant 0 : i32
    %c0_i32_1 = arith.constant 0 : i32
    return %c0_i32, %c0_i32_0 : i32, i32
  }
  func.func @transform_2(%arg0: i32) -> (i32, i32) {
    %c0_i32 = arith.constant 0 : i32
    %c0_i32_0 = arith.constant 0 : i32
    %c0_i32_1 = arith.constant 0 : i32
    return %c0_i32, %c0_i32_0 : i32, i32
  }
  func.func @transform_3(%arg0: i32) -> (i32, i32) {
    %c0_i32 = arith.constant 0 : i32
    %c0_i32_0 = arith.constant 0 : i32
    %c0_i32_1 = arith.constant 0 : i32
    return %c0_i32, %c0_i32_0 : i32, i32
  }
  func.func @transform_4(%arg0: i32) -> (i32, i32) {
    %c0_i32 = arith.constant 0 : i32
    %c0_i32_0 = arith.constant 0 : i32
    %c0_i32_1 = arith.constant 0 : i32
    return %c0_i32, %c0_i32_0 : i32, i32
  }
  func.func @transform_5(%arg0: i32) -> (i32, i32) {
    %c0_i32 = arith.constant 0 : i32
    %c0_i32_0 = arith.constant 0 : i32
    %c0_i32_1 = arith.constant 0 : i32
    return %c0_i32, %c0_i32_0 : i32, i32
  }
  func.func @transform_6(%arg0: i32) -> (i32, i32) {
    %c0_i32 = arith.constant 0 : i32
    %c0_i32_0 = arith.constant 0 : i32
    %c0_i32_1 = arith.constant 0 : i32
    return %c0_i32, %c0_i32_0 : i32, i32
  }
  func.func @transform_7(%arg0: i32) -> (i32, i32) {
    %c0_i32 = arith.constant 0 : i32
    %c0_i32_0 = arith.constant 0 : i32
    return %arg0, %c0_i32 : i32, i32
  }
}

</mosaic_0001>

<bundles_post_ra>
// kernel: attack_model_forward.1
= control target key start
LH: loop header
LB: loop body
LE: loop exit
PB: predicated region body
PF: predicated region fallthrough
CT: control target
= control target key end

     0   :  { %v438_v0 = vmov 0.0   ;;  %vm439_vm0 = vmmov 0   ;;  %vm51_vm1 = vcmask 261120   ;;  %vm321_vm2 = vcmask 15360   ;;  %s573_s1 = inlined_call_operand.vmem [shape: bf16[32,128], index: 1, kind: input, shape index: {}]   ;;  %s574_s3 = inlined_call_operand.vmem [shape: bf16[128,128], index: 3, kind: input, shape index: {}]   ;;  %s575_s0 = inlined_call_operand.vmem [shape: bf16[8,32], index: 0, kind: input, shape index: {}]   ;;  %s576_s5 = inlined_call_operand.vmem [shape: bf16[128,2], index: 5, kind: input, shape index: {}]   ;;  %s577_s2 = inlined_call_operand.vmem [shape: f32[1,128], index: 2, kind: input, shape index: {}]   ;;  %s578_s4 = inlined_call_operand.vmem [shape: f32[1,128], index: 4, kind: input, shape index: {}]   ;;  %s579_s6 = inlined_call_operand.vmem [shape: f32[1,2], index: 6, kind: input, shape index: {}]   ;;  %s580_s7 = inlined_call_operand.vmem [shape: f32[8,2], index: 7, kind: output, shape index: {}]  }
   0x1   :  { %370 = vmatprep.subr.bf16.mxu0 %v438_v0  ;;  %v420_v1 = vld [vmem:[%s573_s1] sm:$0xff]   ;;  %374 = vmatprep.mubr.msk.bf16.mxu0 %vm439_vm0, %v438_v0  ;;  %v421_v2 = vld [vmem:[%s573_s1 + $0x8] sm:$0xff]   ;;  %v424_v6 = vld [vmem:[%s574_s3 + $0x10] sm:$0xff]  }
   0x2   :  { %378 = vmatprep.subr.bf16.mxu1 %v438_v0  ;;  %394 = vmatprep.mubr.msk.bf16.mxu1 %vm439_vm0, %v438_v0  ;;  %v422_v3 = vld [vmem:[%s574_s3] sm:$0xff]   ;;  %v423_v4 = vld [vmem:[%s574_s3 + $0x8] sm:$0xff]   ;;  %v425_v7 = vld [vmem:[%s574_s3 + $0x18] sm:$0xff]  }
   0x3   :  { %371 = vmatpush3.bf16.msra.mxu0 %v420_v1  ;;  %379 = vmatpush3.bf16.msra.mxu1 %v422_v3  ;;  %v27_v5 = vld [vmem:[%s575_s0] sm:$0xf]  ;;  %v427_v9 = vld [vmem:[%s574_s3 + $0x28] sm:$0xff]   ;;  %v428_v10 = vld [vmem:[%s574_s3 + $0x30] sm:$0xff]  }
   0x4   :  { %372 = vmatprep.subr.bf16.mxu0 %v438_v0  ;;  %380 = vmatprep.subr.bf16.mxu1 %v438_v0  ;;  %v426_v8 = vld [vmem:[%s574_s3 + $0x20] sm:$0xff]   ;;  %v429_v11 = vld [vmem:[%s574_s3 + $0x38] sm:$0xff]   ;;  %v431_v13 = vld [vmem:[%s576_s5 + $0x8] sm:$0xff]  }
   0x5   :  { %v430_v12 = vld [vmem:[%s576_s5] sm:$0xff]   ;;  %v432_v14 = vld [vmem:[%s576_s5 + $0x10] sm:$0xff]   ;;  %v433_v15 = vld [vmem:[%s576_s5 + $0x18] sm:$0xff]  }
   0x6   :  { %v434_v16 = vld [vmem:[%s576_s5 + $0x20] sm:$0xff]   ;;  %v435_v17 = vld [vmem:[%s576_s5 + $0x28] sm:$0xff]   ;;  %v436_v26 = vld [vmem:[%s576_s5 + $0x30] sm:$0xff]  }
   0x7   :  { %373 = vmatpush3.bf16.msra.mxu0 %v421_v2  ;;  %381 = vmatpush3.bf16.msra.mxu1 %v423_v4  ;;  %v327_v18 = vld [vmem:[%s577_s2] ss:$0 sm:$0xff]  ;;  %v437_v27 = vld [vmem:[%s576_s5 + $0x38] sm:$0xff]  }
   0x8   :  { %398 = vmatprep.subr.bf16.mxu0 %v438_v0  ;;  %382 = vmatprep.subr.bf16.mxu1 %v438_v0  ;;  %v331_v28 = vld [vmem:[%s578_s4] ss:$0 sm:$0xff] }
   0x9   :  { %v340_v36 = vld [vmem:[%s579_s6] ss:$0 sm:$0xff] }
   0xa   :  { %375 = vmatmul.mubr.msk.bf16.vlgmr.msra.gmra.mrb[0].mxu0 %vm51_vm1, %v27_v5 }
   0xb   :  { %414 = vmatprep.mubr.msk.bf16.mxu0 %vm439_vm0, %v438_v0  ;;  %383 = vmatpush3.bf16.msra.mxu1 %v424_v6 }
   0xc   :  { %384 = vmatprep.subr.bf16.mxu1 %v438_v0  ;;  %399 = vmatpush3.bf16.msra.mxu0 %v430_v12 }
   0xd   :  { %400 = vmatprep.subr.bf16.mxu0 %v438_v0 }
   0xf   :  { %385 = vmatpush3.bf16.msra.mxu1 %v425_v7 }
  0x10   :  { %386 = vmatprep.subr.bf16.mxu1 %v438_v0  ;;  %401 = vmatpush3.bf16.msra.mxu0 %v431_v13 }
  0x11   :  { %402 = vmatprep.subr.bf16.mxu0 %v438_v0 }
  0x13   :  { %387 = vmatpush3.bf16.msra.mxu1 %v426_v8 }
  0x14   :  { %388 = vmatprep.subr.bf16.mxu1 %v438_v0  ;;  %403 = vmatpush3.bf16.msra.mxu0 %v432_v14 }
  0x15   :  { %404 = vmatprep.subr.bf16.mxu0 %v438_v0 }
  0x17   :  { %389 = vmatpush3.bf16.msra.mxu1 %v427_v9 }
  0x18   :  { %390 = vmatprep.subr.bf16.mxu1 %v438_v0  ;;  %405 = vmatpush3.bf16.msra.mxu0 %v433_v15 }
  0x19   :  { %406 = vmatprep.subr.bf16.mxu0 %v438_v0 }
  0x1b   :  { %391 = vmatpush3.bf16.msra.mxu1 %v428_v10 }
  0x1c   :  { %392 = vmatprep.subr.bf16.mxu1 %v438_v0  ;;  %407 = vmatpush3.bf16.msra.mxu0 %v434_v16 }
  0x1d   :  { %408 = vmatprep.subr.bf16.mxu0 %v438_v0 }
  0x1f   :  { %393 = vmatpush3.bf16.msra.mxu1 %v429_v11 }
  0x20   :  { %409 = vmatpush3.bf16.msra.mxu0 %v435_v17 }
  0x21   :  { %410 = vmatprep.subr.bf16.mxu0 %v438_v0 }
  0x24   :  { %411 = vmatpush3.bf16.msra.mxu0 %v436_v26 }
  0x25   :  { %412 = vmatprep.subr.bf16.mxu0 %v438_v0 }
  0x28   :  { %413 = vmatpush3.bf16.msra.mxu0 %v437_v27 }
  0xdd   :  { %v89_v19 = vpop.f32.mrb[0].mxu0 }
  0xde   :  { %v90_v20 = vadd.f32 %v327_v18, %v89_v19  ;;  %v376_v21 = vpop.f32.mrb[1].mxu0 }
  0xdf   :  { %v92_v22 = vpop.f32.mrb[2].mxu0 }
  0xe0   :  { %v95_v23 = vmax.f32 %v90_v20, 0.0  ;;  %v377_v24 = vpop.f32.mrb[3].mxu0 }
  0xe2   :  { %v96_v25 = vpack.c.bf16 %v95_v23, %v95_v23 }
  0xe4   :  { %395 = vmatmul.mubr.bf16.vlgmr.msra.gmra.mrb[0].mxu1 %v96_v25 }
 0x1b7   :  { %v202_v29 = vpop.f32.mrb[0].mxu1 }
 0x1b8   :  { %v203_v30 = vadd.f32 %v331_v28, %v202_v29  ;;  %v396_v31 = vpop.f32.mrb[1].mxu1 }
 0x1b9   :  { %v205_v32 = vpop.f32.mrb[2].mxu1 }
 0x1ba   :  { %v208_v33 = vmax.f32 %v203_v30, 0.0  ;;  %v397_v34 = vpop.f32.mrb[3].mxu1 }
 0x1bc   :  { %v209_v35 = vpack.c.bf16 %v208_v33, %v208_v33 }
 0x1be   :  { %415 = vmatmul.mubr.bf16.vlgmr.msra.gmra.mrb[4].mxu0 %v209_v35 }
 0x291   :  { %v315_v37 = vpop.f32.mrb[4].mxu0 }
 0x292   :  { %v316_v38 = vadd.f32 %v340_v36, %v315_v37  ;;  %v416_v39 = vpop.f32.mrb[5].mxu0 }
 0x293   :  { %v318_v40 = vpop.f32.mrb[6].mxu0 }
 0x294   :  { %322 = vst.msk [vmem:[%s580_s7] sm:$0xff] %vm321_vm2, %v316_v38  ;;  %v417_v41 = vpop.f32.mrb[7].mxu0 }

</bundles_post_ra>
